<compile_context>
chip_gen: v7x
topology: tpu7x:2x2x1
jax: 0.10.0
libtpu: 0.0.40
codegen_flags: <defaults>
</compile_context>

<pallas_src>
import jax
import jax.numpy as jnp
from jax.experimental import pallas as pl
from jax.experimental.pallas import tpu as pltpu

_LANE = 128
_SUBLANE = 8


def _round_up(x, m):
    return (x + m - 1) // m * m


def _tpu_profile():
    """Per-generation tiling / VMEM budgets (conservative fallback for unknown chips)."""
    kind = ""
    try:
        kind = jax.devices()[0].device_kind.lower()
    except Exception:
        pass
    if "v7" in kind or "7x" in kind:     # 64 MiB VMEM / TC -> leave headroom
        return {"lane_tile": 256, "vmem_cap": 48 << 20, "tile_budget": 10 << 20}
    if "v6" in kind:                     # 128 MiB VMEM -> big tiles
        return {"lane_tile": 256, "vmem_cap": 96 << 20, "tile_budget": 24 << 20}
    if "v5" in kind:                     # 128 MiB VMEM, 128x128 MXU
        return {"lane_tile": 128, "vmem_cap": 96 << 20, "tile_budget": 24 << 20}
    return {"lane_tile": 128, "vmem_cap": 40 << 20, "tile_budget": 8 << 20}


def _step_vmem_bytes(th, *, K, Wp, Cin, Ct, isz, osz, fuse):
    """Rough per-grid-step VMEM working set for the chosen H tile."""
    rows = th * Wp
    in_blk = th * Wp * Cin * isz
    halo_blk = (K - 1) * Wp * Cin * isz if K > 1 else 0
    out_blk = rows * Ct * osz
    w_blk = K * K * Cin * Ct * isz
    acc = rows * Ct * 4
    xfull = (rows + (K - 1) * Wp + _SUBLANE) * Cin * isz if K > 1 else 0
    fused_buf = rows * K * Cin * isz if fuse else 0
    return 2 * (in_blk + halo_blk + out_blk + w_blk) + acc + xfull + fused_buf + 8 * Ct


def _pick_h_tile(Ho, step, budget, bytes_fn):
    """Largest multiple of `step` under the VMEM budget, then balanced over ceil(Ho/th)."""
    hi = _round_up(max(Ho, 1), step)
    best = step
    th = 2 * step
    while th <= hi:
        if bytes_fn(th) > budget:
            break
        best = th
        th += step
    best = min(best, hi)
    n_h = -(-Ho // best)                           # spread rows evenly over the tiles so the
    th = min(best, _round_up(-(-Ho // n_h), step))  # zero-padded tail rows stay < step
    return max(th, step)


def _conv_body(x_ref, halo_ref, w_ref, b_ref, o_ref, *, K, activation, fuse):
    """One (Cout-tile, batch, H-tile) output block.

    x_ref:    (1, Th, Wp, Cin)   main rows of the zero-padded NHWC input (Wp % 8 == 0)
    halo_ref: (1, K-1, Wp, Cin)  the K-1 rows following the main block (always in-bounds)
    w_ref:    fuse: (K, K*Cin, Ct) / no-fuse: (K, K, Cin, Ct)
    b_ref:    (1, Ct)            f32 bias tile
    o_ref:    (1, Th, Wp, Ct)    output tile at full padded width (lane-dense, unmasked)
    """
    _, Th, Wp, Cin = x_ref.shape
    Ct = o_ref.shape[-1]
    rows = Th * Wp

    # Flatten (row, W) onto sublanes once; Wp % 8 == 0 so the reshape/concat are
    # sublane-aligned.  This single copy turns every tap window into a contiguous
    # sublane shift of one buffer (no strided (Ho, Wo) repacks).
    x2d = x_ref[...].reshape(rows, Cin)
    if K > 1:
        h2d = halo_ref[...].reshape((K - 1) * Wp, Cin)
        tail = jnp.zeros((_round_up(K - 1, _SUBLANE), Cin), x2d.dtype)  # slack for kx shifts
        xfull = jnp.concatenate([x2d, h2d, tail], axis=0)
    else:
        xfull = x2d

    # Columns x >= Wo of the accumulator only ever receive out-of-window (finite) data and
    # are sliced off by the wrapper; they are < 8 lanes of waste per row.
    acc = None
    if fuse:
        # K dots with contraction K*Cin (lane-aligned channel concat of the kx windows):
        # K accumulator passes instead of K*K and a K x deeper MXU contraction.
        for ky in range(K):
            fused = jnp.concatenate(
                [xfull[ky * Wp + kx: ky * Wp + kx + rows, :] for kx in range(K)],
                axis=-1)
            part = jnp.dot(fused, w_ref[ky], preferred_element_type=jnp.float32)
            acc = part if acc is None else acc + part
    else:
        # TODO(synk): also fuse taps when Cin % 128 != 0 (needs an unaligned lane concat).
        for ky in range(K):
            for kx in range(K):
                win = xfull[ky * Wp + kx: ky * Wp + kx + rows, :]
                part = jnp.dot(win, w_ref[ky, kx], preferred_element_type=jnp.float32)
                acc = part if acc is None else acc + part

    acc = acc + b_ref[...]                 # (1, Ct) broadcast over rows
    if activation:
        acc = jnp.maximum(acc, 0.0)        # ReLU
    o_ref[...] = acc.reshape(1, Th, Wp, Ct).astype(o_ref.dtype)


def _make_kernel(K, activation, fuse):
    if K > 1:
        def kernel(x_ref, halo_ref, w_ref, b_ref, o_ref):
            _conv_body(x_ref, halo_ref, w_ref, b_ref, o_ref,
                       K=K, activation=activation, fuse=fuse)
    else:
        def kernel(x_ref, w_ref, b_ref, o_ref):
            _conv_body(x_ref, None, w_ref, b_ref, o_ref,
                       K=K, activation=activation, fuse=fuse)
    return kernel


def conv_forward_nhwc(x_nhwc, weight_oihw, bias, *, stride=1, padding=None,
                      groups=1, activation=True, mxu_dtype=jnp.bfloat16,
                      out_dtype=None, h_tile=None):
    """conv2d(bias=True) + optional ReLU on NHWC activations via a Pallas TPU kernel."""
    O, I, K, K2 = weight_oihw.shape
    assert K == K2
    padding = K // 2 if padding is None else padding
    if stride != 1 or groups != 1:
        # TODO(synk): only stride=1, groups=1 (the module defaults) are implemented.
        raise NotImplementedError("only stride=1, groups=1 supported")

    N, H, W, Cin = x_nhwc.shape
    assert Cin == I
    out_dtype = x_nhwc.dtype if out_dtype is None else out_dtype

    Ho = H + 2 * padding - K + 1
    Wo = W + 2 * padding - K + 1
    assert Ho >= 1 and Wo >= 1

    # ---- static layout / tiling decisions ------------------------------------
    prof = _tpu_profile()
    Cp = _round_up(O, _LANE)                       # lane-dense Cout (unmasked stores)
    # TODO(synk): for O=64 layers Cp=128 doubles output bytes; a masked 64-wide store or
    # bf16 output (out_dtype) mitigates this.  Late layers (O % 128 == 0) are unaffected.
    Ct = prof["lane_tile"] if Cp % prof["lane_tile"] == 0 else _LANE
    n_c = Cp // Ct

    Wp = _round_up(Wo + K - 1, _SUBLANE)           # padded input width, sublane aligned
    fuse = (K > 1) and (Cin % _LANE == 0)          # lane-aligned channel concat only

    isz = jnp.dtype(mxu_dtype if mxu_dtype is not None else x_nhwc.dtype).itemsize
    osz = jnp.dtype(out_dtype).itemsize
    step_mult = max(K - 1, 1)                      # keeps the (K-1)-row halo index exact
    bytes_fn = lambda t: _step_vmem_bytes(t, K=K, Wp=Wp, Cin=Cin, Ct=Ct,
                                          isz=isz, osz=osz, fuse=fuse)
    if h_tile is None:
        th = _pick_h_tile(Ho, step_mult, prof["tile_budget"], bytes_fn)
    else:
        assert h_tile % step_mult == 0, "h_tile must be a multiple of max(K-1, 1)"
        th = h_tile
    n_h = pl.cdiv(Ho, th)
    Ho_pad = n_h * th                              # output rows >= Ho are zero-input garbage
    Hp_pad = Ho_pad + K - 1                        # padded input height (halo always in range)

    # ---- host-side glue --------------------------------------------------------
    # TODO(synk): a full network should keep activations NHWC / padded between layers and
    # fold the spatial zero-pad into the kernel, avoiding these extra HBM passes per layer.
    x = jnp.pad(x_nhwc, ((0, 0),
                         (padding, Hp_pad - H - padding),
                         (padding, Wp - W - padding),
                         (0, 0)))
    w = jnp.transpose(weight_oihw, (2, 3, 1, 0))           # OIHW -> HWIO (K,K,Cin,O)
    w = jnp.pad(w, ((0, 0), (0, 0), (0, 0), (0, Cp - O)))
    if fuse:
        w = w.reshape(K, K * Cin, Cp)                      # contraction axis = (kx, cin)
    b = jnp.pad(bias, (0, Cp - O)).reshape(1, Cp).astype(jnp.float32)
    if mxu_dtype is not None:                              # bf16 MXU inputs, f32 accumulate
        x = x.astype(mxu_dtype)
        w = w.astype(mxu_dtype)

    # ---- grid & block specs ----------------------------------------------------
    # Cout-tile axis outermost: weight/bias block indices depend only on it, so Pallas keeps
    # them VMEM-resident across all (N, n_h) inner steps.  All axes are independent
    # (the K*K reduction is in-kernel) -> all parallel for megacore.
    grid = (n_c, N, n_h)

    x_spec = pl.BlockSpec((1, th, Wp, Cin), lambda c, n, h: (n, h, 0, 0))
    if fuse:
        w_spec = pl.BlockSpec((K, K * Cin, Ct), lambda c, n, h: (0, 0, c))
    else:
        w_spec = pl.BlockSpec((K, K, Cin, Ct), lambda c, n, h: (0, 0, 0, c))
    b_spec = pl.BlockSpec((1, Ct), lambda c, n, h: (0, c))
    o_spec = pl.BlockSpec((1, th, Wp, Ct), lambda c, n, h: (n, h, 0, c))

    in_specs = [x_spec]
    operands = [x]
    if K > 1:
        # Slim, always in-bounds (K-1)-row halo: th % (K-1) == 0 so the block index is exact.
        hblk = th // (K - 1)
        halo_spec = pl.BlockSpec((1, K - 1, Wp, Cin),
                                 lambda c, n, h: (n, (h + 1) * hblk, 0, 0))
        in_specs.append(halo_spec)
        operands.append(x)                                  # same array, row-halo view
    in_specs += [w_spec, b_spec]
    operands += [w, b]

    est = bytes_fn(th)
    vmem_limit = int(min(prof["vmem_cap"], max(32 << 20, 2 * est)))

    out_padded = pl.pallas_call(
        _make_kernel(K, activation, fuse),
        out_shape=jax.ShapeDtypeStruct((N, Ho_pad, Wp, Cp), out_dtype),
        grid=grid,
        in_specs=in_specs,
        out_specs=o_spec,
        compiler_params=pltpu.CompilerParams(
            dimension_semantics=("parallel", "parallel", "parallel"),
            vmem_limit_bytes=vmem_limit),
    )(*operands)

    return out_padded[:, :Ho, :Wo, :O]


def conv_forward(x_nchw, weight_oihw, bias, **kwargs):
    """PyTorch-layout (NCHW) entry point matching Conv.forward.

    TODO(synk): a full network should keep activations NHWC end-to-end and call
    conv_forward_nhwc directly, avoiding these two HBM transpose passes per layer.
    """
    x = jnp.transpose(x_nchw, (0, 2, 3, 1))
    y = conv_forward_nhwc(x, weight_oihw, bias, **kwargs)
    return jnp.transpose(y, (0, 3, 1, 2))


def _reference(x_nchw, w, b, padding, activation, cast_dtype=None):
    if cast_dtype is not None:
        x_nchw = x_nchw.astype(cast_dtype).astype(jnp.float32)
        w = w.astype(cast_dtype).astype(jnp.float32)
    y = jax.lax.conv_general_dilated(
        x_nchw.astype(jnp.float32), w.astype(jnp.float32), window_strides=(1, 1),
        padding=[(padding, padding), (padding, padding)],
        dimension_numbers=("NCHW", "OIHW", "NCHW"))
    y = y + b.reshape(1, -1, 1, 1)
    if activation:
        y = jnp.maximum(y, 0.0)
    return y


if __name__ == "__main__":
    key = jax.random.PRNGKey(0)
    keys = jax.random.split(key, 11)

    N, Cin, H, W = 2, 4, 16, 16
    Cout = 8
    x = jax.random.normal(keys[0], (N, Cin, H, W), jnp.float32)

    # Config 1: module defaults (kernel_size=1 -> padding=0), ReLU, f32 MXU path.
    w1 = jax.random.normal(keys[1], (Cout, Cin, 1, 1), jnp.float32) * 0.1
    b1 = jax.random.normal(keys[2], (Cout,), jnp.float32) * 0.1
    y1 = jax.block_until_ready(
        conv_forward(x, w1, b1, activation=True, mxu_dtype=jnp.float32))
    r1 = _reference(x, w1, b1, padding=0, activation=True)
    assert y1.shape == (N, Cout, H, W)
    assert jnp.allclose(y1, r1, atol=1e-5, rtol=1e-5), "config1 mismatch"

    # Config 2: kernel_size=3 (padding=1), ReLU, bf16 MXU + bf16 output, two H tiles
    # (exercises the slim halo path and the reduced-precision output).
    w3 = jax.random.normal(keys[3], (Cout, Cin, 3, 3), jnp.float32) * 0.1
    b3 = jax.random.normal(keys[4], (Cout,), jnp.float32) * 0.1
    y2 = jax.block_until_ready(
        conv_forward(x, w3, b3, activation=True, mxu_dtype=jnp.bfloat16,
                     out_dtype=jnp.bfloat16, h_tile=8))
    r2 = _reference(x, w3, b3, padding=1, activation=True, cast_dtype=jnp.bfloat16)
    assert y2.shape == (N, Cout, H, W) and y2.dtype == jnp.bfloat16
    assert jnp.allclose(y2.astype(jnp.float32), r2, atol=8e-3, rtol=2e-2), "config2 mismatch"

    # Config 3: same conv exactly in f32, four H tiles (many slim halo blocks).
    y3 = jax.block_until_ready(
        conv_forward(x, w3, b3, activation=True, mxu_dtype=jnp.float32, h_tile=4))
    r3 = _reference(x, w3, b3, padding=1, activation=True)
    assert jnp.allclose(y3, r3, atol=1e-5, rtol=1e-5), "config3 mismatch"

    # Config 4: odd spatial/channel sizes (exercises W/H/Cout zero-padding), no ReLU.
    N4, C4, H4, W4, O4 = 1, 3, 15, 15, 5
    x4 = jax.random.normal(keys[5], (N4, C4, H4, W4), jnp.float32)
    w4 = jax.random.normal(keys[6], (O4, C4, 3, 3), jnp.float32) * 0.1
    b4 = jax.random.normal(keys[7], (O4,), jnp.float32) * 0.1
    y4 = jax.block_until_ready(
        conv_forward(x4, w4, b4, activation=False, mxu_dtype=jnp.float32))
    r4 = _reference(x4, w4, b4, padding=1, activation=False)
    assert y4.shape == (N4, O4, H4, W4)
    assert jnp.allclose(y4, r4, atol=1e-5, rtol=1e-5), "config4 mismatch"

    # Config 5: Cin=128 -> exercises the fused-tap path (K dots with contraction K*Cin).
    N5, C5, H5, W5, O5 = 1, 128, 8, 8, 32
    x5 = jax.random.normal(keys[8], (N5, C5, H5, W5), jnp.float32)
    w5 = jax.random.normal(keys[9], (O5, C5, 3, 3), jnp.float32) * 0.1
    b5 = jax.random.normal(keys[10], (O5,), jnp.float32) * 0.1
    y5 = jax.block_until_ready(
        conv_forward(x5, w5, b5, activation=True, mxu_dtype=jnp.float32))
    r5 = _reference(x5, w5, b5, padding=1, activation=True)
    assert y5.shape == (N5, O5, H5, W5)
    assert jnp.allclose(y5, r5, atol=1e-4, rtol=1e-4), "config5 mismatch"

    print("KERNEL_OK")
</pallas_src>

<mosaic_0001>
module attributes {stable_mosaic.version = 11 : i64} {
  func.func @kernel(%arg0: i32, %arg1: i32, %arg2: i32, %arg3: memref<1x16x16x4xf32, #tpu.memory_space<vmem>>, %arg4: memref<1x1x4x128xf32, #tpu.memory_space<vmem>>, %arg5: memref<1x128xf32, #tpu.memory_space<vmem>>, %arg6: memref<1x16x16x128xf32, #tpu.memory_space<vmem>>) attributes {dimension_semantics = [#tpu.dimension_semantics<parallel>, #tpu.dimension_semantics<parallel>, #tpu.dimension_semantics<parallel>], iteration_bounds = array<i64: 1, 2, 1>, scalar_prefetch = 0 : i64, scratch_operands = 0 : i64, tpu.core_type = #tpu.core_type<tc>, window_params = [{transform_indices = @transform_0, window_bounds = array<i64: 1, 16, 16, 4>}, {transform_indices = @transform_1, window_bounds = array<i64: 1, 1, 4, 128>}, {transform_indices = @transform_2, window_bounds = array<i64: 1, 128>}, {transform_indices = @transform_3, window_bounds = array<i64: 1, 16, 16, 128>}]} {
    %c0 = arith.constant 0 : index
    %c0_0 = arith.constant 0 : index
    %c0_1 = arith.constant 0 : index
    %c0_2 = arith.constant 0 : index
    %0 = vector.load %arg3[%c0, %c0_0, %c0_1, %c0_2] : memref<1x16x16x4xf32, #tpu.memory_space<vmem>>, vector<1x16x16x4xf32>
    %1 = vector.shape_cast %0 : vector<1x16x16x4xf32> to vector<256x4xf32>
    %c0_3 = arith.constant 0 : index
    %c0_4 = arith.constant 0 : index
    %c0_5 = arith.constant 0 : index
    %c0_6 = arith.constant 0 : index
    %2 = vector.load %arg4[%c0_3, %c0_4, %c0_5, %c0_6] : memref<1x1x4x128xf32, #tpu.memory_space<vmem>>, vector<1x1x4x128xf32>
    %3 = vector.shape_cast %2 : vector<1x1x4x128xf32> to vector<4x128xf32>
    %cst = arith.constant dense<0.000000e+00> : vector<256x128xf32>
    %4 = tpu.matmul %1, %3, %cst {dimension_numbers = #tpu.dot_dimension_numbers<[1], [0], [0], [1], [0, 0, 1, 1], [], []>} : vector<256x4xf32>, vector<4x128xf32>, vector<256x128xf32> -> vector<256x128xf32>
    %c0_7 = arith.constant 0 : index
    %c0_8 = arith.constant 0 : index
    %5 = vector.load %arg5[%c0_7, %c0_8] : memref<1x128xf32, #tpu.memory_space<vmem>>, vector<1x128xf32>
    %6 = vector.broadcast %5 : vector<1x128xf32> to vector<256x128xf32>
    %7 = arith.addf %4, %6 : vector<256x128xf32>
    %cst_9 = arith.constant 0.000000e+00 : f32
    %8 = vector.broadcast %cst_9 : f32 to vector<256x128xf32>
    %9 = arith.maximumf %7, %8 : vector<256x128xf32>
    %10 = vector.shape_cast %9 : vector<256x128xf32> to vector<1x16x16x128xf32>
    %c0_10 = arith.constant 0 : index
    %c0_11 = arith.constant 0 : index
    %c0_12 = arith.constant 0 : index
    %c0_13 = arith.constant 0 : index
    %11 = vector.load %arg6[%c0_10, %c0_11, %c0_12, %c0_13] : memref<1x16x16x128xf32, #tpu.memory_space<vmem>>, vector<1x16x16x128xf32>
    tpu.vector_store %arg6[%c0_10, %c0_11, %c0_12, %c0_13], %10 {strides = array<i32>} : memref<1x16x16x128xf32, #tpu.memory_space<vmem>>, vector<1x16x16x128xf32>,
    return
  }
  func.func @transform_0(%arg0: i32, %arg1: i32, %arg2: i32) -> (i32, i32, i32, i32) {
    %c0_i32 = arith.constant 0 : i32
    %c0_i32_0 = arith.constant 0 : i32
    %c0_i32_1 = arith.constant 0 : i32
    return %arg1, %arg2, %c0_i32, %c0_i32_0 : i32, i32, i32, i32
  }
  func.func @transform_1(%arg0: i32, %arg1: i32, %arg2: i32) -> (i32, i32, i32, i32) {
    %c0_i32 = arith.constant 0 : i32
    %c0_i32_0 = arith.constant 0 : i32
    %c0_i32_1 = arith.constant 0 : i32
    %c0_i32_2 = arith.constant 0 : i32
    return %c0_i32, %c0_i32_0, %c0_i32_1, %arg0 : i32, i32, i32, i32
  }
  func.func @transform_2(%arg0: i32, %arg1: i32, %arg2: i32) -> (i32, i32) {
    %c0_i32 = arith.constant 0 : i32
    %c0_i32_0 = arith.constant 0 : i32
    return %c0_i32, %arg0 : i32, i32
  }
  func.func @transform_3(%arg0: i32, %arg1: i32, %arg2: i32) -> (i32, i32, i32, i32) {
    %c0_i32 = arith.constant 0 : i32
    %c0_i32_0 = arith.constant 0 : i32
    return %arg1, %arg2, %c0_i32, %arg0 : i32, i32, i32, i32
  }
}

</mosaic_0001>

<bundles_post_ra>
// kernel: tpu_custom_call.1
= control target key start
LH: loop header
LB: loop body
LE: loop exit
PB: predicated region body
PF: predicated region fallthrough
CT: control target
= control target key end

     0   :  { %8 = vsyncpa [#allocation3], 0  ;;  %s1360_s0 = inlined_call_operand.vmem [shape: f32[2,16,16,4], index: 0, kind: input, shape index: {}]   ;;  %s1361_s1 = inlined_call_operand.vmem [shape: f32[1,1,4,128], index: 1, kind: input, shape index: {}]   ;;  %s1362_s2 = inlined_call_operand.vmem [shape: f32[1,128], index: 2, kind: input, shape index: {}]   ;;  %s1363_s3 = inlined_call_operand.hbm [shape: f32[2,16,16,128], index: 3, kind: output, shape index: {}]  }
   0x1   :  { %10 = vsyncpa [#allocation3 + $0x1], 0  ;;  %s1100_s12 = smov 0   ;;  %s1102_s13 = smov 0  }
   0x2   :  { %s1104_s14 = smov 0   ;;  %s1106_s15 = smov 0  }
   0x3   :  { %s1108_s16 = smov 0   ;;  %s1110_s17 = smov 0  }
   0x4 LB: > { %s804_s18 = sadd.s32 4294967295, %s1075_s17   ;;  %s805_s19 = sadd.s32 4294967294, %s1075_s17   ;;  %s1075_s17 = sphi %s1110_s17, %s16_s17   ;;  %s1071_s16 = sphi %s1108_s16, %s1370_s16   ;;  %s1067_s15 = sphi %s1106_s15, %s1369_s15   ;;  %s1063_s14 = sphi %s1104_s14, %s1368_s14   ;;  %s1059_s13 = sphi %s1102_s13, %s1367_s13   ;;  %s1055_s12 = sphi %s1100_s12, %s1366_s12  }
   0x5   : > { %s31_s20 = sadd.s32 1, %s1071_s16  ;;  %s126_s21 = sadd.s32 1, %s1063_s14 }
   0x6   : > { %p33_p0 = scmp.ge.s32.totalorder %s31_s20, 2  ;;  %p136_p1 = scmp.ne.s32.totalorder %s1063_s14, %s1059_s13 }
   0x7   : > { %p137_p2 = scmp.eq.s32.totalorder %s804_s18, 1  ;;  %p142_p3 = scmp.ne.s32.totalorder %s1059_s13, %s1055_s12 }
   0x8   : > { %s1372_s20 = smov (%p33_p0, %s31_s20), 0  ;;  %p143_p5 = scmp.eq.s32.totalorder %s805_s19, 1 }
   0x9   : > { %p1140_p4 = por %p137_p2, %p136_p1  ;;  %s119_s23 = ssub.s32 %s1071_s16, %s1372_s20 }
   0xa   : > { %p810_p6 = scmp.ge.s32.totalorder %s1075_s17, 1  ;;  %p124_p7 = scmp.eq.s32.totalorder %s119_s23, 0 }
   0xb   : > { %p1147_p8 = por %p143_p5, %p142_p3  ;;  %p188_p9 = scmp.lt.s32.totalorder %s1075_s17, 3 }
   0xc   : > { %s1153_s25 = scalar_select %p124_p7, %s1063_s14, %s126_s21  }
   0xd   : > { %p189_p10 = pnand %p810_p6, %p188_p9 }
   0xe   : > { %v275_v0 = vld [vmem:[%s1361_s1] sm:$0xf] (!%p189_p10)  ;;  %vm380_vm0 = vcmask (!%p189_p10), 1043456   ;;  %p225_p11 = scmp.lt.s32.totalorder (!%p189_p10), %s1067_s15, 1  ;;  %vm283_vm1 = vcmask (!%p189_p10), 31744   ;;  %s221_s6 = sand.u32 (!%p189_p10), 1, %s1059_s13  }
   0xf   : > { %192 = sbr.rel (%p189_p10) target bundleno = 289 (0x121), region = 32  ;;  %888 = vmatprep.subr.msk.mxu0 (!%p189_p10), %vm380_vm0, %v275_v0  ;;  %938 = vmatprep.subr.msk.mxu1 (!%p189_p10), %vm380_vm0, %v275_v0  ;;  %v1233_v33 = vld [vmem:[%s1362_s2] ss:$0 sm:$0xff] (!%p189_p10)  ;;  %s811_s9 = sshll.u32 (!%p189_p10), %s221_s6, 8 }
  0x10   : > { %889 = vmatpush3.msk.msra.mxu0 (!%p189_p10), %vm380_vm0, %v275_v0  ;;  %939 = vmatpush3.msk.msra.mxu1 (!%p189_p10), %vm380_vm0, %v275_v0  ;;  %s1241_s10 = scalar_lea.vmem (!%p189_p10), [#allocation2], %s811_s9  ;;  %s854_s11 = sshll.u32 (!%p189_p10), %s1067_s15, 12 }
  0x11   : > { %s691_s18 = sshll.u32 (!%p189_p10), %s1241_s10, 4  ;;  %s1304_s21 = scalar_lea.hbm (!%p189_p10), %s1363_s3, %s854_s11  ;;  %s1306_s18 = int_to_ptr.vmem [resolvable:$true] %s691_s18 }
  0x12   : > { %s1314_s23 = scalar_lea.sflag (!%p189_p10), [#allocation3], %s221_s6  ;;  %s997_s26 = scalar_lea.vmem (!%p189_p10), %s1306_s18, 4096 }
  0x13   : > { %p998_p12 = scmp.ne.s32.totalorder (!%p189_p10), %s1306_s18, %s997_s26  ;;  %s1077_s27 = smov (!%p189_p10), [#allocation2]  }
  0x15   : > { %p999_p13 = pnand (!%p189_p10), %p998_p12, %p1140_p4 }
  0x16   : > { %s226_s28 = scalar_select %p225_p11, %s1067_s15, 1 }
  0x17   : > { %p1000_p0 = pneg %p999_p13 }
  0x18   : > { %s853_s29 = sshll.u32 %s226_s28, 8  ;;  %s1001_s28 = sshll.u32 %s1077_s27, 4  ;;  %s1002_s28 = int_to_ptr.vmem [resolvable:$false] %s1001_s28 }
  0x19   : > { %s1163_s5 = scalar_lea.vmem %s1360_s0, %s853_s29  ;;  %s1003_s29 = scalar_lea.vmem %s1002_s28, 8192 }
  0x1a   : > { %v243_v1 = vld [vmem:[%s1163_s5] sm:$0xff]  ;;  %v244_v3 = vld [vmem:[%s1163_s5 + $0x8] sm:$0xff]  ;;  %v245_v5 = vld [vmem:[%s1163_s5 + $0x10] sm:$0xff]  ;;  %p1004_p1 = scmp.lt.s32.totalorder %s1306_s18, %s1002_s28  ;;  %p1005_p2 = scmp.lt.s32.totalorder %s1003_s29, %s997_s26 }
  0x1b   : > { %v259_v2 = vld [vmem:[%s1163_s5 + $0x80] sm:$0xff]  ;;  %890 = vmatprep.mubr.msk.f32.mxu0 %vm283_vm1, %v243_v1  ;;  %v260_v4 = vld [vmem:[%s1163_s5 + $0x88] sm:$0xff]  ;;  %v261_v6 = vld [vmem:[%s1163_s5 + $0x90] sm:$0xff] }
  0x1c   : > { %914 = vmatprep.mubr.msk.f32.mxu1 %vm283_vm1, %v259_v2  ;;  %891 = vmatmul.mubr.msk.f32.vlgmr.msra.gmra.mrb[0].mxu0 %vm283_vm1, %v244_v3  ;;  %v246_v7 = vld [vmem:[%s1163_s5 + $0x18] sm:$0xff]  ;;  %v247_v9 = vld [vmem:[%s1163_s5 + $0x20] sm:$0xff]  ;;  %v248_v11 = vld [vmem:[%s1163_s5 + $0x28] sm:$0xff]  ;;  %p1006_p3 = por %p1005_p2, %p1004_p1 }
  0x1d   : > { %915 = vmatmul.mubr.msk.f32.vlgmr.msra.gmra.mrb[0].mxu1 %vm283_vm1, %v260_v4  ;;  %893 = vmatprep.mubr.msk.f32.mxu0 %vm283_vm1, %v245_v5  ;;  %v262_v8 = vld [vmem:[%s1163_s5 + $0x98] sm:$0xff]  ;;  %v263_v10 = vld [vmem:[%s1163_s5 + $0xa0] sm:$0xff]  ;;  %v264_v12 = vld [vmem:[%s1163_s5 + $0xa8] sm:$0xff] }
  0x1e   : > { %917 = vmatprep.mubr.msk.f32.mxu1 %vm283_vm1, %v261_v6  ;;  %v249_v13 = vld [vmem:[%s1163_s5 + $0x30] sm:$0xff]  ;;  %v250_v15 = vld [vmem:[%s1163_s5 + $0x38] sm:$0xff]  ;;  %v251_v17 = vld [vmem:[%s1163_s5 + $0x40] sm:$0xff]  ;;  %p1007_p5 = pnand %p1006_p3, %p1000_p0 }
  0x1f   : > { %v265_v14 = vld [vmem:[%s1163_s5 + $0xb0] sm:$0xff]  ;;  %v266_v16 = vld [vmem:[%s1163_s5 + $0xb8] sm:$0xff]  ;;  %v267_v18 = vld [vmem:[%s1163_s5 + $0xc0] sm:$0xff] }
  0x20   : > { %894 = vmatmul.mubr.msk.f32.gmra.mrb[2].mxu0 %vm283_vm1, %v246_v7  ;;  %v252_v19 = vld [vmem:[%s1163_s5 + $0x48] sm:$0xff]  ;;  %v253_v21 = vld [vmem:[%s1163_s5 + $0x50] sm:$0xff]  ;;  %v254_v23 = vld [vmem:[%s1163_s5 + $0x58] sm:$0xff] }
  0x21   : > { %918 = vmatmul.mubr.msk.f32.gmra.mrb[2].mxu1 %vm283_vm1, %v262_v8  ;;  %896 = vmatprep.mubr.msk.f32.mxu0 %vm283_vm1, %v247_v9  ;;  %v268_v20 = vld [vmem:[%s1163_s5 + $0xc8] sm:$0xff]  ;;  %v269_v22 = vld [vmem:[%s1163_s5 + $0xd0] sm:$0xff]  ;;  %v270_v24 = vld [vmem:[%s1163_s5 + $0xd8] sm:$0xff] }
  0x22   : > { %920 = vmatprep.mubr.msk.f32.mxu1 %vm283_vm1, %v263_v10  ;;  %v255_v25 = vld [vmem:[%s1163_s5 + $0x60] sm:$0xff]  ;;  %v256_v27 = vld [vmem:[%s1163_s5 + $0x68] sm:$0xff]  ;;  %v257_v29 = vld [vmem:[%s1163_s5 + $0x70] sm:$0xff] }
  0x23   : > { %v271_v26 = vld [vmem:[%s1163_s5 + $0xe0] sm:$0xff]  ;;  %v272_v28 = vld [vmem:[%s1163_s5 + $0xe8] sm:$0xff]  ;;  %v273_v30 = vld [vmem:[%s1163_s5 + $0xf0] sm:$0xff] }
  0x24   : > { %897 = vmatmul.mubr.msk.f32.gmra.mrb[4].mxu0 %vm283_vm1, %v248_v11  ;;  %v258_v31 = vld [vmem:[%s1163_s5 + $0x78] sm:$0xff] }
  0x25   : > { %921 = vmatmul.mubr.msk.f32.gmra.mrb[4].mxu1 %vm283_vm1, %v264_v12  ;;  %899 = vmatprep.mubr.msk.f32.mxu0 %vm283_vm1, %v249_v13  ;;  %v274_v32 = vld [vmem:[%s1163_s5 + $0xf8] sm:$0xff] }
  0x26   : > { %923 = vmatprep.mubr.msk.f32.mxu1 %vm283_vm1, %v265_v14 }
  0x28   : > { %900 = vmatmul.mubr.msk.f32.gmra.mrb[6].mxu0 %vm283_vm1, %v250_v15 }
  0x29   : > { %924 = vmatmul.mubr.msk.f32.gmra.mrb[6].mxu1 %vm283_vm1, %v266_v16  ;;  %902 = vmatprep.mubr.msk.f32.mxu0 %vm283_vm1, %v251_v17 }
  0x2a   : > { %926 = vmatprep.mubr.msk.f32.mxu1 %vm283_vm1, %v267_v18 }
  0x2c   : > { %903 = vmatmul.mubr.msk.f32.gmra.mrb[8].mxu0 %vm283_vm1, %v252_v19 }
  0x2d   : > { %927 = vmatmul.mubr.msk.f32.gmra.mrb[8].mxu1 %vm283_vm1, %v268_v20  ;;  %905 = vmatprep.mubr.msk.f32.mxu0 %vm283_vm1, %v253_v21 }
  0x2e   : > { %929 = vmatprep.mubr.msk.f32.mxu1 %vm283_vm1, %v269_v22 }
  0x30   : > { %906 = vmatmul.mubr.msk.f32.gmra.mrb[10].mxu0 %vm283_vm1, %v254_v23 }
  0x31   : > { %930 = vmatmul.mubr.msk.f32.gmra.mrb[10].mxu1 %vm283_vm1, %v270_v24  ;;  %908 = vmatprep.mubr.msk.f32.mxu0 %vm283_vm1, %v255_v25 }
  0x32   : > { %932 = vmatprep.mubr.msk.f32.mxu1 %vm283_vm1, %v271_v26 }
  0x34   : > { %909 = vmatmul.mubr.msk.f32.gmra.mrb[12].mxu0 %vm283_vm1, %v256_v27 }
  0x35   : > { %933 = vmatmul.mubr.msk.f32.gmra.mrb[12].mxu1 %vm283_vm1, %v272_v28  ;;  %911 = vmatprep.mubr.msk.f32.mxu0 %vm283_vm1, %v257_v29 }
  0x36   : > { %935 = vmatprep.mubr.msk.f32.mxu1 %vm283_vm1, %v273_v30 }
  0x38   : > { %912 = vmatmul.mubr.msk.f32.gmra.mrb[14].mxu0 %vm283_vm1, %v258_v31 }
  0x39   : > { %936 = vmatmul.mubr.msk.f32.gmra.mrb[14].mxu1 %vm283_vm1, %v274_v32 }
  0xef   : > { %v892_v34 = vpop.f32.mrb[0].mxu0 }
  0xf0   : > { %v916_v35 = vpop.f32.mrb[0].mxu1  ;;  %v456_v36 = vadd.f32 %v892_v34, %v1233_v33  ;;  %v450_v38 = vpop.f32.mrb[1].mxu0 }
  0xf1   : > { %v536_v37 = vadd.f32 %v916_v35, %v1233_v33  ;;  %v530_v39 = vpop.f32.mrb[1].mxu1  ;;  %v451_v40 = vadd.f32 %v1233_v33, %v450_v38 }
  0xf2   : > { %v531_v41 = vadd.f32 %v1233_v33, %v530_v39  ;;  %v610_v42 = vmax.f32 %v456_v36, 0.0 }
  0xf3   : > { %v626_v43 = vmax.f32 %v536_v37, 0.0  ;;  %v609_v44 = vmax.f32 %v451_v40, 0.0  ;;  %v895_v46 = vpop.f32.mrb[2].mxu0 }
  0xf4   : > { %v625_v45 = vmax.f32 %v531_v41, 0.0  ;;  %v919_v47 = vpop.f32.mrb[2].mxu1  ;;  %642 = vst [vmem:[%s1241_s10 + $0x8] sm:$0xff] %v610_v42  ;;  %v466_v48 = vadd.f32 %v895_v46, %v1233_v33  ;;  %v460_v50 = vpop.f32.mrb[3].mxu0 }
  0xf5   : > { %658 = vst [vmem:[%s1241_s10 + $0x88] sm:$0xff] %v626_v43  ;;  %v546_v49 = vadd.f32 %v919_v47, %v1233_v33  ;;  %v540_v51 = vpop.f32.mrb[3].mxu1  ;;  %641 = vst [vmem:[%s1241_s10] sm:$0xff] %v609_v44  ;;  %v461_v52 = vadd.f32 %v1233_v33, %v460_v50 }
  0xf6   : > { %657 = vst [vmem:[%s1241_s10 + $0x80] sm:$0xff] %v625_v45  ;;  %v541_v53 = vadd.f32 %v1233_v33, %v540_v51  ;;  %v612_v54 = vmax.f32 %v466_v48, 0.0 }
  0xf7   : > { %v628_v55 = vmax.f32 %v546_v49, 0.0  ;;  %v611_v56 = vmax.f32 %v461_v52, 0.0  ;;  %v898_v58 = vpop.f32.mrb[4].mxu0 }
  0xf8   : > { %v627_v57 = vmax.f32 %v541_v53, 0.0  ;;  %v922_v59 = vpop.f32.mrb[4].mxu1  ;;  %644 = vst [vmem:[%s1241_s10 + $0x18] sm:$0xff] %v612_v54  ;;  %v476_v60 = vadd.f32 %v898_v58, %v1233_v33  ;;  %v470_v62 = vpop.f32.mrb[5].mxu0 }
  0xf9   : > { %660 = vst [vmem:[%s1241_s10 + $0x98] sm:$0xff] %v628_v55  ;;  %v556_v61 = vadd.f32 %v922_v59, %v1233_v33  ;;  %v550_v63 = vpop.f32.mrb[5].mxu1  ;;  %643 = vst [vmem:[%s1241_s10 + $0x10] sm:$0xff] %v611_v56  ;;  %v471_v0 = vadd.f32 %v1233_v33, %v470_v62 }
  0xfa   : > { %659 = vst [vmem:[%s1241_s10 + $0x90] sm:$0xff] %v627_v57  ;;  %v551_v1 = vadd.f32 %v1233_v33, %v550_v63  ;;  %v614_v2 = vmax.f32 %v476_v60, 0.0 }
  0xfb   : > { %v630_v3 = vmax.f32 %v556_v61, 0.0  ;;  %v613_v4 = vmax.f32 %v471_v0, 0.0  ;;  %v901_v6 = vpop.f32.mrb[6].mxu0 }
  0xfc   : > { %v629_v5 = vmax.f32 %v551_v1, 0.0  ;;  %v925_v7 = vpop.f32.mrb[6].mxu1  ;;  %646 = vst [vmem:[%s1241_s10 + $0x28] sm:$0xff] %v614_v2  ;;  %v486_v8 = vadd.f32 %v901_v6, %v1233_v33  ;;  %v480_v10 = vpop.f32.mrb[7].mxu0 }
  0xfd   : > { %662 = vst [vmem:[%s1241_s10 + $0xa8] sm:$0xff] %v630_v3  ;;  %v566_v9 = vadd.f32 %v925_v7, %v1233_v33  ;;  %v560_v11 = vpop.f32.mrb[7].mxu1  ;;  %645 = vst [vmem:[%s1241_s10 + $0x20] sm:$0xff] %v613_v4  ;;  %v481_v12 = vadd.f32 %v1233_v33, %v480_v10 }
  0xfe   : > { %661 = vst [vmem:[%s1241_s10 + $0xa0] sm:$0xff] %v629_v5  ;;  %v561_v13 = vadd.f32 %v1233_v33, %v560_v11  ;;  %v616_v14 = vmax.f32 %v486_v8, 0.0 }
  0xff   : > { %v632_v15 = vmax.f32 %v566_v9, 0.0  ;;  %v615_v16 = vmax.f32 %v481_v12, 0.0  ;;  %v904_v18 = vpop.f32.mrb[8].mxu0 }
 0x100   : > { %v631_v17 = vmax.f32 %v561_v13, 0.0  ;;  %v928_v19 = vpop.f32.mrb[8].mxu1  ;;  %648 = vst [vmem:[%s1241_s10 + $0x38] sm:$0xff] %v616_v14  ;;  %v496_v20 = vadd.f32 %v904_v18, %v1233_v33  ;;  %v490_v22 = vpop.f32.mrb[9].mxu0 }
 0x101   : > { %664 = vst [vmem:[%s1241_s10 + $0xb8] sm:$0xff] %v632_v15  ;;  %v576_v21 = vadd.f32 %v928_v19, %v1233_v33  ;;  %v570_v23 = vpop.f32.mrb[9].mxu1  ;;  %647 = vst [vmem:[%s1241_s10 + $0x30] sm:$0xff] %v615_v16  ;;  %v491_v24 = vadd.f32 %v1233_v33, %v490_v22 }
 0x102   : > { %663 = vst [vmem:[%s1241_s10 + $0xb0] sm:$0xff] %v631_v17  ;;  %v571_v25 = vadd.f32 %v1233_v33, %v570_v23  ;;  %v618_v26 = vmax.f32 %v496_v20, 0.0 }
 0x103   : > { %v634_v27 = vmax.f32 %v576_v21, 0.0  ;;  %v617_v28 = vmax.f32 %v491_v24, 0.0  ;;  %v907_v30 = vpop.f32.mrb[10].mxu0 }
 0x104   : > { %v633_v29 = vmax.f32 %v571_v25, 0.0  ;;  %v931_v31 = vpop.f32.mrb[10].mxu1  ;;  %650 = vst [vmem:[%s1241_s10 + $0x48] sm:$0xff] %v618_v26  ;;  %v506_v32 = vadd.f32 %v907_v30, %v1233_v33  ;;  %v500_v35 = vpop.f32.mrb[11].mxu0 }
 0x105   : > { %666 = vst [vmem:[%s1241_s10 + $0xc8] sm:$0xff] %v634_v27  ;;  %v586_v34 = vadd.f32 %v931_v31, %v1233_v33  ;;  %v580_v36 = vpop.f32.mrb[11].mxu1  ;;  %649 = vst [vmem:[%s1241_s10 + $0x40] sm:$0xff] %v617_v28  ;;  %v501_v37 = vadd.f32 %v1233_v33, %v500_v35 }
 0x106   : > { %665 = vst [vmem:[%s1241_s10 + $0xc0] sm:$0xff] %v633_v29  ;;  %v581_v38 = vadd.f32 %v1233_v33, %v580_v36  ;;  %v620_v39 = vmax.f32 %v506_v32, 0.0 }
 0x107   : > { %v636_v40 = vmax.f32 %v586_v34, 0.0  ;;  %v619_v41 = vmax.f32 %v501_v37, 0.0  ;;  %v910_v43 = vpop.f32.mrb[12].mxu0 }
 0x108   : > { %v635_v42 = vmax.f32 %v581_v38, 0.0  ;;  %v934_v44 = vpop.f32.mrb[12].mxu1  ;;  %652 = vst [vmem:[%s1241_s10 + $0x58] sm:$0xff] %v620_v39  ;;  %v516_v45 = vadd.f32 %v910_v43, %v1233_v33  ;;  %v510_v47 = vpop.f32.mrb[13].mxu0 }
 0x109   : > { %668 = vst [vmem:[%s1241_s10 + $0xd8] sm:$0xff] %v636_v40  ;;  %v596_v46 = vadd.f32 %v934_v44, %v1233_v33  ;;  %v590_v48 = vpop.f32.mrb[13].mxu1  ;;  %651 = vst [vmem:[%s1241_s10 + $0x50] sm:$0xff] %v619_v41  ;;  %v511_v49 = vadd.f32 %v1233_v33, %v510_v47 }
 0x10a   : > { %667 = vst [vmem:[%s1241_s10 + $0xd0] sm:$0xff] %v635_v42  ;;  %v591_v50 = vadd.f32 %v1233_v33, %v590_v48  ;;  %v622_v51 = vmax.f32 %v516_v45, 0.0 }
 0x10b   : > { %v638_v52 = vmax.f32 %v596_v46, 0.0  ;;  %v621_v53 = vmax.f32 %v511_v49, 0.0  ;;  %v913_v55 = vpop.f32.mrb[14].mxu0 }
 0x10c   : > { %v637_v54 = vmax.f32 %v591_v50, 0.0  ;;  %v937_v56 = vpop.f32.mrb[14].mxu1  ;;  %654 = vst [vmem:[%s1241_s10 + $0x68] sm:$0xff] %v622_v51  ;;  %v526_v57 = vadd.f32 %v913_v55, %v1233_v33  ;;  %v520_v59 = vpop.f32.mrb[15].mxu0 }
 0x10d   : > { %670 = vst [vmem:[%s1241_s10 + $0xe8] sm:$0xff] %v638_v52  ;;  %v606_v58 = vadd.f32 %v937_v56, %v1233_v33  ;;  %v600_v60 = vpop.f32.mrb[15].mxu1  ;;  %653 = vst [vmem:[%s1241_s10 + $0x60] sm:$0xff] %v621_v53  ;;  %v521_v61 = vadd.f32 %v1233_v33, %v520_v59 }
 0x10e   : > { %669 = vst [vmem:[%s1241_s10 + $0xe0] sm:$0xff] %v637_v54  ;;  %v601_v62 = vadd.f32 %v1233_v33, %v600_v60  ;;  %v624_v63 = vmax.f32 %v526_v57, 0.0 }
 0x10f   : > { %v640_v0 = vmax.f32 %v606_v58, 0.0  ;;  %v623_v1 = vmax.f32 %v521_v61, 0.0 }
 0x110   : > { %v639_v2 = vmax.f32 %v601_v62, 0.0  ;;  %656 = vst [vmem:[%s1241_s10 + $0x78] sm:$0xff] %v624_v63 }
 0x111   : > { %672 = vst [vmem:[%s1241_s10 + $0xf8] sm:$0xff] %v640_v0  ;;  %655 = vst [vmem:[%s1241_s10 + $0x70] sm:$0xff] %v623_v1 }
 0x112   : > { %671 = vst [vmem:[%s1241_s10 + $0xf0] sm:$0xff] %v639_v2 }
 0x113   : > { %1010 = shalt.err (!%p1007_p5)
}
 0x114   : > { %s1011_s30 = scalar_lea.hbm %s1304_s21, 4096  ;;  %s1015_s6 = scalar_lea.hbm %s1363_s3, 8192 }
 0x115   : > { %p1012_p6 = scmp.ne.s32.totalorder %s1304_s21, %s1011_s30  ;;  %p1016_p10 = scmp.lt.u32.totalorder %s1304_s21, %s1363_s3 }
 0x116   : > { %p1017_p11 = scmp.lt.u32.totalorder %s1015_s6, %s1011_s30  ;;  %p1019_p13 = scmp.lt.u32.totalorder %s1011_s30, %s1304_s21 }
 0x117   : > { %p1013_p7 = pnand %p1012_p6, %p1140_p4 }
 0x118   : > { %p1018_p12 = por %p1017_p11, %p1016_p10 }
 0x119   : > { %p1014_p9 = pneg %p1013_p7 }
 0x11a   : > { %p1020_p0 = por %p1019_p13, %p1018_p12 }
 0x11c   : > { %p1021_p1 = pnand %p1020_p0, %p1014_p9 }
 0x11e   : > { %1024 = shalt.err (!%p1021_p1)
}
 0x11f   : > { %s1078_s9 = smov 128   ;;  %s1079_s10 = smov 8  }
 0x120   : > { %940 = dma.vmem_to_hbm [thread:$0]  (%p1140_p4), %s1306_s18, 4096, %s1304_s21, %s1314_s23, %s1078_s9, %s1078_s9, %s1079_s10  }
 0x121 PF: > { %p946_p2 = scmp.ge.s32.totalorder %s1075_s17, 2  ;;  %s706_s11 = sand.u32 1, %s1055_s12  }
 0x122   : > { %s707_s15 = scalar_lea.sflag [#allocation3], %s706_s11 }
 0x123   : > { %p943_p3 = pnand %p946_p2, %p1147_p8 }
 0x125   : > { %1050 = dma.done.wait (!%p943_p3), %s707_s15, 4096  }
 0x126   : > { %1052 = vsyncadd (!%p943_p3), %s707_s15, 4294963200  ;;  %s16_s17 = sadd.s32 1, %s1075_s17   ;;  %s1366_s12 = smov %s1059_s13 }
 0x127   : > { %p13_p5 = scmp.ge.s32.totalorder %s16_s17, 4   ;;  %s1367_s13 = smov %s1063_s14 }
 0x128   : > { %s1368_s14 = smov %s1153_s25  ;;  %s1369_s15 = smov %s1071_s16 }
 0x129   : > { %s1370_s16 = smov %s1372_s20  ;;  %15 = sbr.rel (!%p13_p5) target bundleno = 4 (0x4), region = 73 }
 0x130   :  { %712 = vsyncpa [#allocation3], 1 }
 0x131   :  { %714 = vsyncpa [#allocation3 + $0x1], 1 }

</bundles_post_ra>
